<compile_context>
chip_gen: v7x
topology: tpu7x:2x2x1
jax: 0.10.0
libtpu: 0.0.40
codegen_flags: <defaults>
</compile_context>

<pallas_src>
import functools

import jax
import jax.numpy as jnp
from jax.experimental import pallas as pl
from jax.experimental.pallas import tpu as pltpu

# Default tile sizes (sized for production hidden=10000, batch~8).
TK = 1024   # K (reduction) chunk streamed per grid step
TN = 2048   # N (output-column) stripe; parallel axis -> megacore split on v7x


def _round_up(x, m):
    return (x + m - 1) // m * m


def _tile_dims(K, N, tk, tn):
    """Effective tile sizes (clamped to the 128-rounded problem) + padded dims."""
    tk_eff = min(tk, _round_up(K, 128))
    tn_eff = min(tn, _round_up(N, 128))
    return tk_eff, tn_eff, _round_up(K, tk_eff), _round_up(N, tn_eff)


def _linear_kernel(x_ref, w_ref, b_ref, o_ref, acc_ref):
    """One (M, tn) output stripe; reduction over K on grid axis 1 (innermost)."""
    k = pl.program_id(1)

    @pl.when(k == 0)
    def _():
        acc_ref[...] = jnp.zeros_like(acc_ref)

    acc_ref[...] += jnp.dot(
        x_ref[...], w_ref[...], preferred_element_type=jnp.float32
    )

    @pl.when(k == pl.num_programs(1) - 1)
    def _():
        o_ref[...] = (acc_ref[...] + b_ref[...]).astype(o_ref.dtype)


@functools.partial(jax.jit, static_argnames=("n_out", "tn", "tk"))
def pallas_linear(x, w_p, b_p, n_out, *, tn=TN, tk=TK):
    """y = x @ w + b with pre-padded weights w_p:(Kp,Np) and bias b_p:(1,Np).

    x: (M, K) with K <= Kp (zero-padded here, it is tiny); returns (M, n_out).
    """
    M, K = x.shape
    Kp, Np = w_p.shape
    tk_eff = min(tk, Kp)
    tn_eff = min(tn, Np)
    assert Kp % tk_eff == 0 and Np % tn_eff == 0, "weights not padded for tiles"
    assert K <= Kp and n_out <= Np

    if Kp != K:  # zero padding is exact: padded K rows contribute 0
        x = jnp.pad(x, ((0, 0), (0, Kp - K)))

    grid = (Np // tn_eff, Kp // tk_eff)  # (parallel N stripes, K reduction chunks)

    grid_spec = pltpu.PrefetchScalarGridSpec(
        num_scalar_prefetch=0,
        grid=grid,
        in_specs=[
            pl.BlockSpec((M, tk_eff), lambda j, k: (0, k)),        # activations
            pl.BlockSpec((tk_eff, tn_eff), lambda j, k: (k, j)),   # streamed weights
            pl.BlockSpec((1, tn_eff), lambda j, k: (0, j)),        # bias stripe
        ],
        out_specs=pl.BlockSpec((M, tn_eff), lambda j, k: (0, j)),  # resident over k
        scratch_shapes=[pltpu.VMEM((M, tn_eff), jnp.float32)],
    )

    out_p = pl.pallas_call(
        _linear_kernel,
        out_shape=jax.ShapeDtypeStruct((M, Np), x.dtype),
        grid_spec=grid_spec,
        compiler_params=pltpu.CompilerParams(
            dimension_semantics=("parallel", "arbitrary"),
            vmem_limit_bytes=48 * 1024 * 1024,
        ),
    )(x, w_p, b_p)

    return out_p[:, :n_out] if Np != n_out else out_p


def pad_params(params, *, tn=TN, tk=TK):
    """Zero-pad (w_t, b) ONCE so K/N are exact multiples of the tiles."""
    padded = []
    for w_t, b in params:
        K, N = w_t.shape
        _, _, Kp, Np = _tile_dims(K, N, tk, tn)
        w_p = jnp.pad(w_t, ((0, Kp - K), (0, Np - N))) if (Kp, Np) != (K, N) else w_t
        b_p = (jnp.pad(b, (0, Np - N)) if Np != N else b).reshape(1, Np)
        padded.append((w_p, b_p, N))
    return padded


def layer_forward(x, padded_params, *, tn=TN, tk=TK):
    """Apply the 10 stacked Linear layers (one Pallas kernel call per layer)."""
    # NOTE: deliberately NOT fused into one pallas_call -- each layer must stream
    # its full weight matrix from HBM regardless; inter-layer activations are tiny.
    for w_p, b_p, n_out in padded_params:
        x = pallas_linear(x, w_p, b_p, n_out, tn=tn, tk=tk)
    return x


def init_params(key, hidden, num_layers):
    """Deterministic init mimicking nn.Linear default (uniform +-1/sqrt(in))."""
    # TODO(synk): for ~2x bandwidth headroom the weights could be cast to bf16 here
    # (f32 accumulation stays in-kernel); kept f32 to match nn.Linear semantics.
    params = []
    bound = 1.0 / float(hidden) ** 0.5
    for _ in range(num_layers):
        kw, kb, key = jax.random.split(key, 3)
        w_t = jax.random.uniform(             # stored already transposed: (in, out)
            kw, (hidden, hidden), jnp.float32, minval=-bound, maxval=bound
        )
        b = jax.random.uniform(
            kb, (hidden,), jnp.float32, minval=-bound, maxval=bound
        )
        params.append((w_t, b))
    return params


if __name__ == "__main__":
    # Small shapes consistent with the module; HIDDEN deliberately NOT a multiple
    # of 128 (like the real hidden=10000) to exercise the padding path.
    BATCH, HIDDEN, NUM_LAYERS = 8, 200, 10

    key = jax.random.PRNGKey(0)
    kx, kp = jax.random.split(key)
    x = jax.random.normal(kx, (BATCH, HIDDEN), jnp.float32)
    params = init_params(kp, HIDDEN, NUM_LAYERS)
    padded_params = pad_params(params)

    out = layer_forward(x, padded_params)
    out = jax.block_until_ready(out)

    # Reference check in plain JAX (same math: x @ W.T + b per layer, unpadded).
    ref = x
    for w_t, b in params:
        ref = ref @ w_t + b
    assert out.shape == (BATCH, HIDDEN)
    assert jnp.allclose(out, ref, rtol=1e-3, atol=1e-4), "mismatch vs reference"

    print("KERNEL_OK")
</pallas_src>

<mosaic_0001>
module attributes {stable_mosaic.version = 11 : i64} {
  func.func @_linear_kernel(%arg0: i32, %arg1: i32, %arg2: memref<8x256xf32, #tpu.memory_space<vmem>>, %arg3: memref<256x256xf32, #tpu.memory_space<vmem>>, %arg4: memref<1x256xf32, #tpu.memory_space<vmem>>, %arg5: memref<8x256xf32, #tpu.memory_space<vmem>>, %arg6: memref<8x256xf32, #tpu.memory_space<vmem>>) attributes {dimension_semantics = [#tpu.dimension_semantics<parallel>, #tpu.dimension_semantics<arbitrary>], iteration_bounds = array<i64: 1, 1>, scalar_prefetch = 0 : i64, scratch_operands = 1 : i64, tpu.core_type = #tpu.core_type<tc>, window_params = [{transform_indices = @transform_0, window_bounds = array<i64: 8, 256>}, {transform_indices = @transform_1, window_bounds = array<i64: 256, 256>}, {transform_indices = @transform_2, window_bounds = array<i64: 1, 256>}, {transform_indices = @transform_3, window_bounds = array<i64: 8, 256>}]} {
    %c0_i32 = arith.constant 0 : i32
    %0 = arith.cmpi eq, %arg1, %c0_i32 : i32
    %1 = arith.extui %0 : i1 to i32
    %c0_i32_0 = arith.constant 0 : i32
    %2 = arith.cmpi ne, %1, %c0_i32_0 : i32
    scf.if %2 {
      %cst_10 = arith.constant 0.000000e+00 : f32
      %12 = vector.broadcast %cst_10 : f32 to vector<8x256xf32>
      %c0_11 = arith.constant 0 : index
      %c0_12 = arith.constant 0 : index
      %13 = vector.load %arg6[%c0_11, %c0_12] : memref<8x256xf32, #tpu.memory_space<vmem>>, vector<8x256xf32>
      tpu.vector_store %arg6[%c0_11, %c0_12], %12 {strides = array<i32>} : memref<8x256xf32, #tpu.memory_space<vmem>>, vector<8x256xf32>,
    } else {
    }
    %c0 = arith.constant 0 : index
    %c0_1 = arith.constant 0 : index
    %3 = vector.load %arg6[%c0, %c0_1] : memref<8x256xf32, #tpu.memory_space<vmem>>, vector<8x256xf32>
    %c0_2 = arith.constant 0 : index
    %c0_3 = arith.constant 0 : index
    %4 = vector.load %arg2[%c0_2, %c0_3] : memref<8x256xf32, #tpu.memory_space<vmem>>, vector<8x256xf32>
    %c0_4 = arith.constant 0 : index
    %c0_5 = arith.constant 0 : index
    %5 = vector.load %arg3[%c0_4, %c0_5] : memref<256x256xf32, #tpu.memory_space<vmem>>, vector<256x256xf32>
    %cst = arith.constant dense<0.000000e+00> : vector<8x256xf32>
    %6 = tpu.matmul %4, %5, %cst {dimension_numbers = #tpu.dot_dimension_numbers<[1], [0], [0], [1], [0, 0, 1, 1], [], []>} : vector<8x256xf32>, vector<256x256xf32>, vector<8x256xf32> -> vector<8x256xf32>
    %7 = arith.addf %3, %6 : vector<8x256xf32>
    %c0_6 = arith.constant 0 : index
    %c0_7 = arith.constant 0 : index
    %8 = vector.load %arg6[%c0_6, %c0_7] : memref<8x256xf32, #tpu.memory_space<vmem>>, vector<8x256xf32>
    tpu.vector_store %arg6[%c0_6, %c0_7], %7 {strides = array<i32>} : memref<8x256xf32, #tpu.memory_space<vmem>>, vector<8x256xf32>,
    %c0_i32_8 = arith.constant 0 : i32
    %9 = arith.cmpi eq, %arg1, %c0_i32_8 : i32
    %10 = arith.extui %9 : i1 to i32
    %c0_i32_9 = arith.constant 0 : i32
    %11 = arith.cmpi ne, %10, %c0_i32_9 : i32
    scf.if %11 {
      %c0_10 = arith.constant 0 : index
      %c0_11 = arith.constant 0 : index
      %12 = vector.load %arg6[%c0_10, %c0_11] : memref<8x256xf32, #tpu.memory_space<vmem>>, vector<8x256xf32>
      %c0_12 = arith.constant 0 : index
      %c0_13 = arith.constant 0 : index
      %13 = vector.load %arg4[%c0_12, %c0_13] : memref<1x256xf32, #tpu.memory_space<vmem>>, vector<1x256xf32>
      %14 = vector.broadcast %13 : vector<1x256xf32> to vector<8x256xf32>
      %15 = arith.addf %12, %14 : vector<8x256xf32>
      %c0_14 = arith.constant 0 : index
      %c0_15 = arith.constant 0 : index
      %16 = vector.load %arg5[%c0_14, %c0_15] : memref<8x256xf32, #tpu.memory_space<vmem>>, vector<8x256xf32>
      tpu.vector_store %arg5[%c0_14, %c0_15], %15 {strides = array<i32>} : memref<8x256xf32, #tpu.memory_space<vmem>>, vector<8x256xf32>,
    } else {
    }
    return
  }
  func.func @transform_0(%arg0: i32, %arg1: i32) -> (i32, i32) {
    %c0_i32 = arith.constant 0 : i32
    %c0_i32_0 = arith.constant 0 : i32
    return %c0_i32, %arg1 : i32, i32
  }
  func.func @transform_1(%arg0: i32, %arg1: i32) -> (i32, i32) {
    %c0_i32 = arith.constant 0 : i32
    return %arg1, %arg0 : i32, i32
  }
  func.func @transform_2(%arg0: i32, %arg1: i32) -> (i32, i32) {
    %c0_i32 = arith.constant 0 : i32
    %c0_i32_0 = arith.constant 0 : i32
    return %c0_i32, %arg0 : i32, i32
  }
  func.func @transform_3(%arg0: i32, %arg1: i32) -> (i32, i32) {
    %c0_i32 = arith.constant 0 : i32
    %c0_i32_0 = arith.constant 0 : i32
    return %c0_i32, %arg0 : i32, i32
  }
}

</mosaic_0001>

<bundles_post_ra>
// kernel: pallas_linear.1
= control target key start
LH: loop header
LB: loop body
LE: loop exit
PB: predicated region body
PF: predicated region fallthrough
CT: control target
= control target key end

     0   :  { %8 = vsyncpa [#allocation4], 0  ;;  %s387_s0 = inlined_call_operand.vmem [shape: f32[8,256], index: 0, kind: input, shape index: {}]   ;;  %s388_s1 = inlined_call_operand.hbm [shape: f32[256,256], index: 1, kind: input, shape index: {}]   ;;  %s389_s2 = inlined_call_operand.vmem [shape: f32[1,256], index: 2, kind: input, shape index: {}]   ;;  %s390_s3 = inlined_call_operand.hbm [shape: f32[8,256], index: 3, kind: output, shape index: {}]  }
   0x1   :  { %9 = vsyncpa [#allocation5], 0  ;;  %s330_s12 = smov [#allocation3]   ;;  %s282_s16 = scalar_lea.hbm %s388_s1, 8192 }
   0x2   :  { %s17_s13 = sshll.u32 %s330_s12, 4  ;;  %p283_p0 = scmp.ne.s32.totalorder %s388_s1, %s282_s16  ;;  %s18_s13 = int_to_ptr.vmem [resolvable:$true] %s17_s13 }
   0x3   :  { %p286_p1 = scmp.lt.u32.totalorder %s282_s16, %s388_s1 }
   0x5   :  { %p288_p2 = pnand %p286_p1, %p283_p0 }
   0x7   :  { %291 = shalt.err (!%p288_p2)
}
   0x8   :  { %s292_s21 = scalar_lea.vmem %s18_s13, 8192  ;;  %p297_p4 = scmp.lt.s32.totalorder %s18_s13, %s18_s13 }
   0x9   :  { %p293_p3 = scmp.ne.s32.totalorder %s18_s13, %s292_s21  ;;  %p298_p5 = scmp.lt.s32.totalorder %s292_s21, %s292_s21 }
   0xb   :  { %p299_p6 = por %p298_p5, %p297_p4 }
   0xd   :  { %p300_p7 = pnand %p299_p6, %p293_p3 }
   0xf   :  { %303 = shalt.err (!%p300_p7)
}
  0x10   :  { %s331_s22 = smov 256   ;;  %s332_s23 = smov 16  }
  0x11   :  { %23 = dma.hbm_to_vmem [thread:$0]  %s388_s1, 8192, %s18_s13, [#allocation4], %s331_s22, %s331_s22, %s332_s23  }
  0x12   :  { %326 = dma.done.wait [#allocation4], 8192  }
  0x13   :  { %327 = vsyncadd [#allocation4], 4294959104  ;;  %v40_v0 = vld [vmem:[#allocation3 + $0x8] sm:$0xff]  ;;  %v42_v1 = vld [vmem:[#allocation3 + $0x18] sm:$0xff]  ;;  %s333_s4 = smov [#allocation6]  }
  0x14   :  { %v39_v2 = vld [vmem:[#allocation3] sm:$0xff]  ;;  %v214_v3 = vpack.c.bf16 %v42_v1, %v40_v0  ;;  %v41_v4 = vld [vmem:[#allocation3 + $0x10] sm:$0xff]  ;;  %v44_v5 = vld [vmem:[#allocation3 + $0x28] sm:$0xff]  ;;  %s205_s5 = sshll.u32 %s333_s4, 4  ;;  %s206_s5 = int_to_ptr.vmem [resolvable:$true] %s205_s5 }
  0x15   :  { %v46_v6 = vld [vmem:[#allocation3 + $0x38] sm:$0xff]  ;;  %v216_v7 = vpack.c.bf16 %v41_v4, %v39_v2  ;;  %v43_v9 = vld [vmem:[#allocation3 + $0x20] sm:$0xff]  ;;  %v45_v10 = vld [vmem:[#allocation3 + $0x30] sm:$0xff]  ;;  %p309_p9 = scmp.lt.s32.totalorder %s206_s5, %s206_s5 }
  0x16   :  { %v218_v8 = vpack.c.bf16 %v46_v6, %v44_v5  ;;  %v48_v11 = vld [vmem:[#allocation3 + $0x48] sm:$0xff]  ;;  %215 = vmatprep.subr.bf16.mxu0 %v214_v3  ;;  %v50_v12 = vld [vmem:[#allocation3 + $0x58] sm:$0xff]  ;;  %v220_v13 = vpack.c.bf16 %v45_v10, %v43_v9  ;;  %v47_v15 = vld [vmem:[#allocation3 + $0x40] sm:$0xff] }
  0x17   :  { %217 = vmatpush1.bf16.msra.mxu0 %v216_v7  ;;  %v222_v14 = vpack.c.bf16 %v50_v12, %v48_v11  ;;  %v49_v16 = vld [vmem:[#allocation3 + $0x50] sm:$0xff]  ;;  %v52_v17 = vld [vmem:[#allocation3 + $0x68] sm:$0xff]  ;;  %v54_v18 = vld [vmem:[#allocation3 + $0x78] sm:$0xff] }
  0x18   :  { %219 = vmatprep.subr.bf16.mxu0 %v218_v8  ;;  %v224_v19 = vpack.c.bf16 %v49_v16, %v47_v15  ;;  %v226_v20 = vpack.c.bf16 %v54_v18, %v52_v17  ;;  %v51_v21 = vld [vmem:[#allocation3 + $0x60] sm:$0xff]  ;;  %v53_v22 = vld [vmem:[#allocation3 + $0x70] sm:$0xff]  ;;  %v56_v23 = vld [vmem:[#allocation3 + $0x88] sm:$0xff] }
  0x19   :  { %v58_v24 = vld [vmem:[#allocation3 + $0x98] sm:$0xff]  ;;  %v228_v25 = vpack.c.bf16 %v53_v22, %v51_v21  ;;  %v55_v27 = vld [vmem:[#allocation3 + $0x80] sm:$0xff]  ;;  %v57_v28 = vld [vmem:[#allocation3 + $0x90] sm:$0xff] }
  0x1a   :  { %v230_v26 = vpack.c.bf16 %v58_v24, %v56_v23  ;;  %v60_v29 = vld [vmem:[#allocation3 + $0xa8] sm:$0xff]  ;;  %v62_v30 = vld [vmem:[#allocation3 + $0xb8] sm:$0xff]  ;;  %v232_v31 = vpack.c.bf16 %v57_v28, %v55_v27  ;;  %v59_v33 = vld [vmem:[#allocation3 + $0xa0] sm:$0xff] }
  0x1b   :  { %221 = vmatpush1.bf16.msra.mxu0 %v220_v13  ;;  %v234_v32 = vpack.c.bf16 %v62_v30, %v60_v29  ;;  %v61_v34 = vld [vmem:[#allocation3 + $0xb0] sm:$0xff]  ;;  %v64_v35 = vld [vmem:[#allocation3 + $0xc8] sm:$0xff]  ;;  %v66_v36 = vld [vmem:[#allocation3 + $0xd8] sm:$0xff] }
  0x1c   :  { %223 = vmatprep.subr.bf16.mxu0 %v222_v14  ;;  %v236_v37 = vpack.c.bf16 %v61_v34, %v59_v33  ;;  %v238_v38 = vpack.c.bf16 %v66_v36, %v64_v35  ;;  %v63_v39 = vld [vmem:[#allocation3 + $0xc0] sm:$0xff]  ;;  %v65_v40 = vld [vmem:[#allocation3 + $0xd0] sm:$0xff]  ;;  %v38_v41 = vld [vmem:[%s387_s0 + $0x8] sm:$0xff]  ;;  %v185_v34 = vlaneseq }
  0x1d   :  { %v68_v42 = vld [vmem:[#allocation3 + $0xe8] sm:$0xff]  ;;  %v70_v43 = vld [vmem:[#allocation3 + $0xf8] sm:$0xff]  ;;  %167 = vmatprep.mubr.f32.mxu0 %v38_v41  ;;  %v240_v44 = vpack.c.bf16 %v65_v40, %v63_v39  ;;  %v67_v46 = vld [vmem:[#allocation3 + $0xe0] sm:$0xff] }
  0x1e   :  { %v242_v45 = vpack.c.bf16 %v70_v43, %v68_v42  ;;  %v69_v47 = vld [vmem:[#allocation3 + $0xf0] sm:$0xff]  ;;  %v72_v48 = vld [vmem:[#allocation3 + $0x108] sm:$0xff]  ;;  %v74_v49 = vld [vmem:[#allocation3 + $0x118] sm:$0xff]  ;;  %v186_v35 = vshrl.u32 %v185_v34, 7 }
  0x1f   :  { %225 = vmatpush1.bf16.msra.mxu0 %v224_v19  ;;  %v244_v50 = vpack.c.bf16 %v69_v47, %v67_v46  ;;  %v246_v51 = vpack.c.bf16 %v74_v49, %v72_v48  ;;  %v71_v52 = vld [vmem:[#allocation3 + $0x100] sm:$0xff]  ;;  %v73_v53 = vld [vmem:[#allocation3 + $0x110] sm:$0xff]  ;;  %v76_v54 = vld [vmem:[#allocation3 + $0x128] sm:$0xff] }
  0x20   :  { %227 = vmatprep.subr.bf16.mxu0 %v226_v20  ;;  %v78_v55 = vld [vmem:[#allocation3 + $0x138] sm:$0xff]  ;;  %v248_v56 = vpack.c.bf16 %v73_v53, %v71_v52  ;;  %v75_v58 = vld [vmem:[#allocation3 + $0x120] sm:$0xff]  ;;  %v77_v59 = vld [vmem:[#allocation3 + $0x130] sm:$0xff]  ;;  %v187_v36 = vsub.s32 0, %v186_v35 }
  0x21   :  { %v250_v57 = vpack.c.bf16 %v78_v55, %v76_v54  ;;  %v80_v60 = vld [vmem:[#allocation3 + $0x148] sm:$0xff]  ;;  %v82_v61 = vld [vmem:[#allocation3 + $0x158] sm:$0xff]  ;;  %v252_v62 = vpack.c.bf16 %v77_v59, %v75_v58  ;;  %v79_v0 = vld [vmem:[#allocation3 + $0x140] sm:$0xff] }
  0x22   :  { %v254_v63 = vpack.c.bf16 %v82_v61, %v80_v60  ;;  %v81_v1 = vld [vmem:[#allocation3 + $0x150] sm:$0xff]  ;;  %v84_v2 = vld [vmem:[#allocation3 + $0x168] sm:$0xff]  ;;  %v86_v3 = vld [vmem:[#allocation3 + $0x178] sm:$0xff] }
  0x23   :  { %229 = vmatpush1.bf16.msra.mxu0 %v228_v25  ;;  %v256_v4 = vpack.c.bf16 %v81_v1, %v79_v0  ;;  %v258_v5 = vpack.c.bf16 %v86_v3, %v84_v2  ;;  %v83_v6 = vld [vmem:[#allocation3 + $0x160] sm:$0xff]  ;;  %v85_v7 = vld [vmem:[#allocation3 + $0x170] sm:$0xff]  ;;  %v88_v8 = vld [vmem:[#allocation3 + $0x188] sm:$0xff] }
  0x24   :  { %231 = vmatprep.subr.bf16.mxu0 %v230_v26  ;;  %v90_v9 = vld [vmem:[#allocation3 + $0x198] sm:$0xff]  ;;  %v260_v10 = vpack.c.bf16 %v85_v7, %v83_v6  ;;  %v87_v12 = vld [vmem:[#allocation3 + $0x180] sm:$0xff]  ;;  %v89_v13 = vld [vmem:[#allocation3 + $0x190] sm:$0xff] }
  0x25   :  { %v262_v11 = vpack.c.bf16 %v90_v9, %v88_v8  ;;  %v92_v14 = vld [vmem:[#allocation3 + $0x1a8] sm:$0xff]  ;;  %v94_v15 = vld [vmem:[#allocation3 + $0x1b8] sm:$0xff]  ;;  %v264_v16 = vpack.c.bf16 %v89_v13, %v87_v12  ;;  %v91_v18 = vld [vmem:[#allocation3 + $0x1a0] sm:$0xff] }
  0x26   :  { %v266_v17 = vpack.c.bf16 %v94_v15, %v92_v14  ;;  %v93_v19 = vld [vmem:[#allocation3 + $0x1b0] sm:$0xff]  ;;  %v96_v20 = vld [vmem:[#allocation3 + $0x1c8] sm:$0xff]  ;;  %v98_v21 = vld [vmem:[#allocation3 + $0x1d8] sm:$0xff] }
  0x27   :  { %233 = vmatpush1.bf16.msra.mxu0 %v232_v31  ;;  %v268_v22 = vpack.c.bf16 %v93_v19, %v91_v18  ;;  %v270_v23 = vpack.c.bf16 %v98_v21, %v96_v20  ;;  %v95_v24 = vld [vmem:[#allocation3 + $0x1c0] sm:$0xff]  ;;  %v97_v25 = vld [vmem:[#allocation3 + $0x1d0] sm:$0xff]  ;;  %v100_v26 = vld [vmem:[#allocation3 + $0x1e8] sm:$0xff] }
  0x28   :  { %235 = vmatprep.subr.bf16.mxu0 %v234_v32  ;;  %v102_v27 = vld [vmem:[#allocation3 + $0x1f8] sm:$0xff]  ;;  %v272_v28 = vpack.c.bf16 %v97_v25, %v95_v24  ;;  %v99_v30 = vld [vmem:[#allocation3 + $0x1e0] sm:$0xff]  ;;  %v101_v31 = vld [vmem:[#allocation3 + $0x1f0] sm:$0xff] }
  0x29   :  { %v274_v29 = vpack.c.bf16 %v102_v27, %v100_v26  ;;  %v276_v32 = vpack.c.bf16 %v101_v31, %v99_v30  ;;  %v37_v33 = vld [vmem:[%s387_s0] sm:$0xff]  ;;  %s304_s0 = scalar_lea.vmem %s206_s5, 256 }
  0x2a   :  { %p305_p8 = scmp.ne.s32.totalorder %s206_s5, %s304_s0  ;;  %p310_p10 = scmp.lt.s32.totalorder %s304_s0, %s304_s0 }
  0x2b   :  { %237 = vmatpush1.bf16.msra.mxu0 %v236_v37  ;;  %v183_v37 = vld [vmem:[%s389_s2] sm:$0x3] }
  0x2c   :  { %239 = vmatprep.subr.bf16.mxu0 %v238_v38  ;;  %v191_v38 = vsub.s32 1, %v186_v35  ;;  %v188_v39 = vrot.slane %v183_v37, %v187_v36  ;;  %p311_p11 = por %p310_p10, %p309_p9 }
  0x2e   :  { %v192_v40 = vrot.slane %v183_v37, %v191_v38  ;;  %p312_p12 = pnand %p311_p11, %p305_p8 }
  0x2f   :  { %241 = vmatpush1.bf16.msra.mxu0 %v240_v44 }
  0x30   :  { %243 = vmatprep.subr.bf16.mxu0 %v242_v45 }
  0x33   :  { %245 = vmatpush1.bf16.msra.mxu0 %v244_v50 }
  0x34   :  { %247 = vmatprep.subr.bf16.mxu0 %v246_v51 }
  0x37   :  { %249 = vmatpush1.bf16.msra.mxu0 %v248_v56 }
  0x38   :  { %251 = vmatprep.subr.bf16.mxu0 %v250_v57 }
  0x3b   :  { %253 = vmatpush1.bf16.msra.mxu0 %v252_v62 }
  0x3c   :  { %255 = vmatprep.subr.bf16.mxu0 %v254_v63 }
  0x3f   :  { %257 = vmatpush1.bf16.msra.mxu0 %v256_v4 }
  0x40   :  { %259 = vmatprep.subr.bf16.mxu0 %v258_v5 }
  0x43   :  { %261 = vmatpush1.bf16.msra.mxu0 %v260_v10 }
  0x44   :  { %263 = vmatprep.subr.bf16.mxu0 %v262_v11 }
  0x47   :  { %265 = vmatpush1.bf16.msra.mxu0 %v264_v16 }
  0x48   :  { %267 = vmatprep.subr.bf16.mxu0 %v266_v17 }
  0x4b   :  { %269 = vmatpush1.bf16.msra.mxu0 %v268_v22 }
  0x4c   :  { %271 = vmatprep.subr.bf16.mxu0 %v270_v23 }
  0x4f   :  { %273 = vmatpush1.bf16.msra.mxu0 %v272_v28 }
  0x50   :  { %275 = vmatprep.subr.bf16.mxu0 %v274_v29 }
  0x53   :  { %277 = vmatpush1.bf16.msra.mxu0 %v276_v32 }
  0x56   :  { %168 = vmatmul.mubr.f32.vlgmr.msra.gmra.mrb[0].mxu0 %v37_v33 }
 0x129   :  { %v169_v41 = vpop.f32.mrb[0].mxu0 }
 0x12a   :  { %v195_v42 = vadd.f32 %v188_v39, %v169_v41  ;;  %v171_v43 = vpop.f32.mrb[1].mxu0 }
 0x12b   :  { %v196_v44 = vadd.f32 %v192_v40, %v171_v43 }
 0x12c   :  { %197 = vst [vmem:[#allocation6] sm:$0xff] %v195_v42 }
 0x12d   :  { %198 = vst [vmem:[#allocation6 + $0x8] sm:$0xff] %v196_v44 }
 0x12e   :  { %315 = shalt.err (!%p312_p12)
}
 0x12f   :  { %s316_s7 = scalar_lea.hbm %s390_s3, 256 }
 0x130   :  { %p317_p13 = scmp.ne.s32.totalorder %s390_s3, %s316_s7  ;;  %p320_p0 = scmp.lt.u32.totalorder %s316_s7, %s390_s3 }
 0x132   :  { %p322_p1 = pnand %p320_p0, %p317_p13 }
 0x134   :  { %325 = shalt.err (!%p322_p1)
}
 0x135   :  { %208 = dma.vmem_to_hbm [thread:$0]  %s206_s5, 256, %s390_s3, [#allocation5]  }
 0x136   :  { %328 = dma.done.wait [#allocation5], 256  }
 0x137   :  { %329 = vsyncadd [#allocation5], 4294967040 }
 0x138   :  { %212 = vsyncpa [#allocation4], 1 }
 0x139   :  { %213 = vsyncpa [#allocation5], 1 }

</bundles_post_ra>
